<compile_context>
chip_gen: v5e
topology: v5e:2x2
jax: 0.10.0
libtpu: 0.0.40
codegen_flags: <defaults>
</compile_context>

<pallas_src>
import math

import jax
import jax.numpy as jnp
from jax.experimental import pallas as pl
from jax.experimental.pallas import tpu as pltpu


_INV_SQRT2 = 1.0 / math.sqrt(2.0)


def _gelu_exact(x):
    # PyTorch nn.GELU() default = exact erf formulation.
    return 0.5 * x * (1.0 + jax.lax.erf(x * _INV_SQRT2))


def _make_mlp_kernel(n_sub, sub_h, hidden_tiled, precision):
    """Build the kernel body.

    Refs (streamed path shown; resident path has th == full hidden):
      x_ref:  (tile_m, in_features)   native dtype
      w1_ref: (in_features, th)       native dtype
      b1_ref: (1, th)                 f32
      w2_ref: (th, out_features)      native dtype
      b2_ref: (1, out_features)       f32
      o_ref:  (tile_m, out_features)  output dtype
      acc_ref:(tile_m, out_features)  f32 VMEM accumulator
    """

    def kernel(x_ref, w1_ref, b1_ref, w2_ref, b2_ref, o_ref, acc_ref):
        def init():
            # fc2 bias is added exactly once, via the accumulator init.
            acc_ref[...] = jnp.broadcast_to(b2_ref[...], acc_ref.shape)

        def compute():
            x = x_ref[...]
            # Unrolled hidden sub-chunks: the fc1 matmul of chunk c+1 can issue on
            # the MXU while the GELU polynomial of chunk c runs on the VPU.
            for c in range(n_sub):
                lo = c * sub_h
                hi = lo + sub_h
                h = jnp.dot(x, w1_ref[:, lo:hi],
                            preferred_element_type=jnp.float32,
                            precision=precision)
                h = _gelu_exact(h + b1_ref[:, lo:hi])
                # dropout(p=0.0) is identity — nothing to do.
                acc_ref[...] += jnp.dot(h.astype(w2_ref.dtype), w2_ref[lo:hi, :],
                                        preferred_element_type=jnp.float32,
                                        precision=precision)

        def finalize():
            o_ref[...] = acc_ref[...].astype(o_ref.dtype)

        if hidden_tiled:
            h_idx = pl.program_id(1)
            pl.when(h_idx == 0)(init)
            compute()
            pl.when(h_idx == pl.num_programs(1) - 1)(finalize)
        else:
            # Weights-resident single-pass: no reduction grid axis.
            init()
            compute()
            finalize()

    return kernel


def _round_up(x, m):
    return ((x + m - 1) // m) * m


def _vmem_capacity_bytes():
    """Per-core VMEM capacity; falls back to the smallest generation (v7x, 64 MiB)."""
    try:
        return int(pltpu.get_tpu_info().vmem_capacity_bytes)
    except Exception:
        return 64 * 1024 * 1024


def _pick_hidden_tile(hidden_p, tile_h):
    """Largest multiple of 128 that divides hidden_p (itself a multiple of 128)
    and is <= tile_h."""
    cand = min(tile_h, hidden_p)
    cand -= cand % 128
    cand = max(cand, 128)
    while cand > 128 and hidden_p % cand != 0:
        cand -= 128
    return cand


def _pick_subchunk(th):
    """>=2 sub-chunks of >=256 lanes (fills the 256-wide MXU) so MXU/VPU overlap;
    unroll capped at 8."""
    if th % 256 != 0 or th < 512:
        return th, 1
    n = th // 256
    while n > 8 and n % 2 == 0:
        n //= 2
    return th // n, n


def mlp_forward(x, w1, b1, w2, b2, *, tile_m=512, tile_h=512, precision=None,
                force_streamed=False):
    """MLP forward: fc2(dropout(gelu(fc1(x)))) with dropout p=0.0 (identity).

    x: (..., in_features); w1: (hidden, in); b1: (hidden,); w2: (out, hidden);
    b2: (out,)  — PyTorch nn.Linear layout.

    precision: optional lax.Precision for the MXU passes. For f32 inputs the
    default is the MXU's default (reduced) precision; pass
    jax.lax.Precision.HIGHEST for full-f32 accuracy, or cast operands to bf16
    wrapper-side for maximum throughput (especially on v5e).
    """
    in_features = x.shape[-1]
    hidden_features = w1.shape[0]
    out_features = w2.shape[0]

    lead_shape = x.shape[:-1]
    rows = math.prod(lead_shape) if lead_shape else 1
    x2d = x.reshape(rows, in_features)

    xbytes = jnp.dtype(x.dtype).itemsize
    wbytes = jnp.dtype(w1.dtype).itemsize
    obytes = xbytes

    cap = _vmem_capacity_bytes()
    # Per-generation ceiling (~85% of physical): v5e/v6e ~108 MiB, v7x ~54 MiB.
    vmem_ceiling = int(cap * 0.85)

    # Row tile: large M so arithmetic intensity per streamed weight byte clears the
    # roofline ridge; multiple of 16 keeps bf16 sublane packing happy.
    tm = min(tile_m, _round_up(rows, 16))

    def _est(tm_, th_):
        return (2 * tm_ * in_features * xbytes                          # x tiles
                + 2 * (in_features * th_ + th_ * out_features) * wbytes  # weight slabs
                + 2 * (th_ + out_features) * 4                           # bias tiles
                + 2 * tm_ * out_features * obytes                        # output tiles
                + tm_ * out_features * 4                                 # f32 accumulator
                + 2 * tm_ * min(th_, 512) * 4)                           # fc1 intermediate

    weight_bytes = (in_features * hidden_features
                    + hidden_features * out_features) * wbytes
    # 2x: Pallas allocates double buffers per input even for constant index_maps.
    resident = (not force_streamed) and (2 * weight_bytes <= cap // 2)

    w1t = w1.T                                      # (in, hidden)
    w2t = w2.T                                      # (hidden, out)
    b1r = b1.reshape(1, hidden_features).astype(jnp.float32)
    b2r = b2.reshape(1, out_features).astype(jnp.float32)

    n_row_tiles = pl.cdiv(rows, tm)
    flops = 2 * rows * hidden_features * (in_features + out_features)

    if resident:
        th = hidden_features
        while _est(tm, th) > vmem_ceiling and tm > 128:
            tm = max(128, _round_up(tm // 2, 16))
        n_row_tiles = pl.cdiv(rows, tm)
        sub_h, n_sub = _pick_subchunk(th)
        kernel = _make_mlp_kernel(n_sub, sub_h, hidden_tiled=False,
                                  precision=precision)
        grid = (n_row_tiles,)
        in_specs = [
            pl.BlockSpec((tm, in_features), lambda i: (i, 0)),
            pl.BlockSpec((in_features, th), lambda i: (0, 0)),   # resident
            pl.BlockSpec((1, th), lambda i: (0, 0)),             # resident
            pl.BlockSpec((th, out_features), lambda i: (0, 0)),  # resident
            pl.BlockSpec((1, out_features), lambda i: (0, 0)),   # resident
        ]
        out_specs = pl.BlockSpec((tm, out_features), lambda i: (i, 0))
        dims = ("parallel",)
        weight_reads = 1
        hidden_p = hidden_features
    else:
        # Streamed hidden axis: pad hidden to a multiple of 128 so the reduction
        # axis tiles evenly (zero-padded W1 columns / W2 rows contribute 0).
        hidden_p = _round_up(hidden_features, 128)
        if hidden_p != hidden_features:
            pad = hidden_p - hidden_features
            w1t = jnp.pad(w1t, ((0, 0), (0, pad)))
            w2t = jnp.pad(w2t, ((0, pad), (0, 0)))
            b1r = jnp.pad(b1r, ((0, 0), (0, pad)))
        th = _pick_hidden_tile(hidden_p, tile_h)
        while _est(tm, th) > vmem_ceiling and th > 128:
            th = _pick_hidden_tile(hidden_p, max(128, th // 2))
        while _est(tm, th) > vmem_ceiling and tm > 128:
            tm = max(128, _round_up(tm // 2, 16))
        n_row_tiles = pl.cdiv(rows, tm)
        sub_h, n_sub = _pick_subchunk(th)
        kernel = _make_mlp_kernel(n_sub, sub_h, hidden_tiled=True,
                                  precision=precision)
        grid = (n_row_tiles, hidden_p // th)
        in_specs = [
            pl.BlockSpec((tm, in_features), lambda i, h: (i, 0)),
            pl.BlockSpec((in_features, th), lambda i, h: (0, h)),
            pl.BlockSpec((1, th), lambda i, h: (0, h)),
            pl.BlockSpec((th, out_features), lambda i, h: (h, 0)),
            pl.BlockSpec((1, out_features), lambda i, h: (0, 0)),
        ]
        out_specs = pl.BlockSpec((tm, out_features), lambda i, h: (i, 0))
        dims = ("parallel", "arbitrary")
        weight_reads = n_row_tiles   # W1/W2 re-streamed for every row tile

    vmem_est = _est(tm, th)
    vmem_limit = int(min(max(int(vmem_est * 1.5), 32 * 1024 * 1024), vmem_ceiling))

    # Honest HBM-traffic estimate for the XLA scheduler.
    bytes_accessed = (
        rows * in_features * xbytes
        + weight_reads * (in_features * hidden_p + hidden_p * out_features) * wbytes
        + n_row_tiles * (hidden_p + out_features) * 4      # biases re-read per row tile
        + rows * out_features * obytes
    )

    out2d = pl.pallas_call(
        kernel,
        out_shape=jax.ShapeDtypeStruct((rows, out_features), x.dtype),
        grid_spec=pltpu.PrefetchScalarGridSpec(
            num_scalar_prefetch=0,
            grid=grid,
            in_specs=in_specs,
            out_specs=out_specs,
            scratch_shapes=[pltpu.VMEM((tm, out_features), jnp.float32)],
        ),
        compiler_params=pltpu.CompilerParams(
            dimension_semantics=dims,
            vmem_limit_bytes=vmem_limit,
        ),
        cost_estimate=pl.CostEstimate(
            flops=flops,
            transcendentals=0,   # exact-erf GELU lowers to a VALU polynomial, not EUP
            bytes_accessed=bytes_accessed,
        ),
    )(x2d, w1t, b1r, w2t, b2r)

    return out2d.reshape(*lead_shape, out_features)


def init_mlp_params(key, in_features, hidden_features, out_features,
                    dtype=jnp.float32):
    """Deterministic init mirroring nn.Linear default (uniform +/- 1/sqrt(fan_in))."""
    k1, k2, k3, k4 = jax.random.split(key, 4)
    bound1 = 1.0 / math.sqrt(in_features)
    bound2 = 1.0 / math.sqrt(hidden_features)
    w1 = jax.random.uniform(k1, (hidden_features, in_features), dtype,
                            minval=-bound1, maxval=bound1)
    b1 = jax.random.uniform(k2, (hidden_features,), dtype,
                            minval=-bound1, maxval=bound1)
    w2 = jax.random.uniform(k3, (out_features, hidden_features), dtype,
                            minval=-bound2, maxval=bound2)
    b2 = jax.random.uniform(k4, (out_features,), dtype,
                            minval=-bound2, maxval=bound2)
    return w1, b1, w2, b2


if __name__ == "__main__":
    key = jax.random.PRNGKey(0)
    kx, kp = jax.random.split(key)

    # Small transformer-style MLP shapes (lane-aligned) — weights-resident path.
    batch, seq = 2, 8
    in_features, hidden_features, out_features = 128, 256, 128

    x = jax.random.normal(kx, (batch, seq, in_features), jnp.float32)
    w1, b1, w2, b2 = init_mlp_params(kp, in_features, hidden_features,
                                     out_features)

    out = mlp_forward(x, w1, b1, w2, b2)
    out = jax.block_until_ready(out)

    # Pure-JAX reference (fc1 -> exact GELU -> fc2; dropout p=0 is identity).
    # Tolerance accommodates MXU default-precision matmul passes vs the XLA reference.
    ref = jax.nn.gelu(x @ w1.T + b1, approximate=False) @ w2.T + b2
    assert out.shape == (batch, seq, out_features)
    assert jnp.allclose(out, ref, atol=2e-2, rtol=2e-2), \
        float(jnp.max(jnp.abs(out - ref)))

    # Also exercise the streamed-hidden path: ragged hidden (320 -> padded to 384),
    # multi-step reduction axis with accumulator init/finalize, ragged row tile.
    x2 = jax.random.normal(kx, (4, 20, 64), jnp.float32)
    w1b, b1b, w2b, b2b = init_mlp_params(kp, 64, 320, 96)
    out2 = mlp_forward(x2, w1b, b1b, w2b, b2b, tile_h=128, force_streamed=True)
    out2 = jax.block_until_ready(out2)
    ref2 = jax.nn.gelu(x2 @ w1b.T + b1b, approximate=False) @ w2b.T + b2b
    assert out2.shape == (4, 20, 96)
    assert jnp.allclose(out2, ref2, atol=2e-2, rtol=2e-2), \
        float(jnp.max(jnp.abs(out2 - ref2)))

    print("KERNEL_OK")
</pallas_src>

<mosaic_0001>
module attributes {stable_mosaic.version = 11 : i64} {
  func.func @kernel(%arg0: i32, %arg1: memref<16x128xf32, #tpu.memory_space<vmem>>, %arg2: memref<128x256xf32, #tpu.memory_space<vmem>>, %arg3: memref<1x256xf32, #tpu.memory_space<vmem>>, %arg4: memref<256x128xf32, #tpu.memory_space<vmem>>, %arg5: memref<1x128xf32, #tpu.memory_space<vmem>>, %arg6: memref<16x128xf32, #tpu.memory_space<vmem>>, %arg7: memref<16x128xf32, #tpu.memory_space<vmem>>) attributes {dimension_semantics = [#tpu.dimension_semantics<parallel>], iteration_bounds = array<i64: 1>, scalar_prefetch = 0 : i64, scratch_operands = 1 : i64, tpu.core_type = #tpu.core_type<tc>, window_params = [{transform_indices = @transform_0, window_bounds = array<i64: 16, 128>}, {pipeline_mode = #tpu.pipeline_mode<synchronous>, transform_indices = @transform_1, window_bounds = array<i64: 128, 256>}, {pipeline_mode = #tpu.pipeline_mode<synchronous>, transform_indices = @transform_2, window_bounds = array<i64: 1, 256>}, {pipeline_mode = #tpu.pipeline_mode<synchronous>, transform_indices = @transform_3, window_bounds = array<i64: 256, 128>}, {pipeline_mode = #tpu.pipeline_mode<synchronous>, transform_indices = @transform_4, window_bounds = array<i64: 1, 128>}, {transform_indices = @transform_5, window_bounds = array<i64: 16, 128>}]} {
    %c0 = arith.constant 0 : index
    %c0_0 = arith.constant 0 : index
    %0 = vector.load %arg5[%c0, %c0_0] : memref<1x128xf32, #tpu.memory_space<vmem>>, vector<1x128xf32>
    %1 = vector.shape_cast %0 : vector<1x128xf32> to vector<1x128xf32>
    %2 = vector.broadcast %1 : vector<1x128xf32> to vector<16x128xf32>
    %c0_1 = arith.constant 0 : index
    %c0_2 = arith.constant 0 : index
    %3 = vector.load %arg7[%c0_1, %c0_2] : memref<16x128xf32, #tpu.memory_space<vmem>>, vector<16x128xf32>
    tpu.vector_store %arg7[%c0_1, %c0_2], %2 {strides = array<i32>} : memref<16x128xf32, #tpu.memory_space<vmem>>, vector<16x128xf32>,
    %c0_3 = arith.constant 0 : index
    %c0_4 = arith.constant 0 : index
    %4 = vector.load %arg1[%c0_3, %c0_4] : memref<16x128xf32, #tpu.memory_space<vmem>>, vector<16x128xf32>
    %c0_5 = arith.constant 0 : index
    %c0_6 = arith.constant 0 : index
    %5 = vector.load %arg2[%c0_5, %c0_6] : memref<128x256xf32, #tpu.memory_space<vmem>>, vector<128x256xf32>
    %cst = arith.constant dense<0.000000e+00> : vector<16x256xf32>
    %6 = tpu.matmul %4, %5, %cst {dimension_numbers = #tpu.dot_dimension_numbers<[1], [0], [0], [1], [0, 0, 1, 1], [], []>} : vector<16x128xf32>, vector<128x256xf32>, vector<16x256xf32> -> vector<16x256xf32>
    %c0_7 = arith.constant 0 : index
    %c0_8 = arith.constant 0 : index
    %7 = vector.load %arg3[%c0_7, %c0_8] : memref<1x256xf32, #tpu.memory_space<vmem>>, vector<1x256xf32>
    %8 = vector.broadcast %7 : vector<1x256xf32> to vector<16x256xf32>
    %9 = arith.addf %6, %8 : vector<16x256xf32>
    %cst_9 = arith.constant 5.000000e-01 : f32
    %10 = vector.broadcast %cst_9 : f32 to vector<16x256xf32>
    %11 = arith.mulf %10, %9 : vector<16x256xf32>
    %cst_10 = arith.constant 0.707106769 : f32
    %12 = vector.broadcast %cst_10 : f32 to vector<16x256xf32>
    %13 = arith.mulf %9, %12 : vector<16x256xf32>
    %14 = math.erf %13 : vector<16x256xf32>
    %cst_11 = arith.constant 1.000000e+00 : f32
    %15 = vector.broadcast %cst_11 : f32 to vector<16x256xf32>
    %16 = arith.addf %15, %14 : vector<16x256xf32>
    %17 = arith.mulf %11, %16 : vector<16x256xf32>
    %c0_12 = arith.constant 0 : index
    %c0_13 = arith.constant 0 : index
    %18 = vector.load %arg7[%c0_12, %c0_13] : memref<16x128xf32, #tpu.memory_space<vmem>>, vector<16x128xf32>
    %c0_14 = arith.constant 0 : index
    %c0_15 = arith.constant 0 : index
    %19 = vector.load %arg4[%c0_14, %c0_15] : memref<256x128xf32, #tpu.memory_space<vmem>>, vector<256x128xf32>
    %cst_16 = arith.constant dense<0.000000e+00> : vector<16x128xf32>
    %20 = tpu.matmul %17, %19, %cst_16 {dimension_numbers = #tpu.dot_dimension_numbers<[1], [0], [0], [1], [0, 0, 1, 1], [], []>} : vector<16x256xf32>, vector<256x128xf32>, vector<16x128xf32> -> vector<16x128xf32>
    %21 = arith.addf %18, %20 : vector<16x128xf32>
    %c0_17 = arith.constant 0 : index
    %c0_18 = arith.constant 0 : index
    %22 = vector.load %arg7[%c0_17, %c0_18] : memref<16x128xf32, #tpu.memory_space<vmem>>, vector<16x128xf32>
    tpu.vector_store %arg7[%c0_17, %c0_18], %21 {strides = array<i32>} : memref<16x128xf32, #tpu.memory_space<vmem>>, vector<16x128xf32>,
    %c0_19 = arith.constant 0 : index
    %c0_20 = arith.constant 0 : index
    %23 = vector.load %arg7[%c0_19, %c0_20] : memref<16x128xf32, #tpu.memory_space<vmem>>, vector<16x128xf32>
    %c0_21 = arith.constant 0 : index
    %c0_22 = arith.constant 0 : index
    %24 = vector.load %arg6[%c0_21, %c0_22] : memref<16x128xf32, #tpu.memory_space<vmem>>, vector<16x128xf32>
    tpu.vector_store %arg6[%c0_21, %c0_22], %23 {strides = array<i32>} : memref<16x128xf32, #tpu.memory_space<vmem>>, vector<16x128xf32>,
    return
  }
  func.func @transform_0(%arg0: i32) -> (i32, i32) {
    %c0_i32 = arith.constant 0 : i32
    %c0_i32_0 = arith.constant 0 : i32
    return %arg0, %c0_i32 : i32, i32
  }
  func.func @transform_1(%arg0: i32) -> (i32, i32) {
    %c0_i32 = arith.constant 0 : i32
    %c0_i32_0 = arith.constant 0 : i32
    %c0_i32_1 = arith.constant 0 : i32
    return %c0_i32, %c0_i32_0 : i32, i32
  }
  func.func @transform_2(%arg0: i32) -> (i32, i32) {
    %c0_i32 = arith.constant 0 : i32
    %c0_i32_0 = arith.constant 0 : i32
    %c0_i32_1 = arith.constant 0 : i32
    return %c0_i32, %c0_i32_0 : i32, i32
  }
  func.func @transform_3(%arg0: i32) -> (i32, i32) {
    %c0_i32 = arith.constant 0 : i32
    %c0_i32_0 = arith.constant 0 : i32
    %c0_i32_1 = arith.constant 0 : i32
    return %c0_i32, %c0_i32_0 : i32, i32
  }
  func.func @transform_4(%arg0: i32) -> (i32, i32) {
    %c0_i32 = arith.constant 0 : i32
    %c0_i32_0 = arith.constant 0 : i32
    %c0_i32_1 = arith.constant 0 : i32
    return %c0_i32, %c0_i32_0 : i32, i32
  }
  func.func @transform_5(%arg0: i32) -> (i32, i32) {
    %c0_i32 = arith.constant 0 : i32
    %c0_i32_0 = arith.constant 0 : i32
    return %arg0, %c0_i32 : i32, i32
  }
}

</mosaic_0001>

<bundles_post_ra>
// kernel: tpu_custom_call.1
= control target key start
LH: loop header
LB: loop body
LE: loop exit
PB: predicated region body
PF: predicated region fallthrough
CT: control target
= control target key end

     0   :  { %10 = vsyncpa [#allocation4], 0  ;;  %s773_s0 = inlined_call_operand.hbm [shape: f32[16,128], index: 0, kind: input, shape index: {}]   ;;  %s774_s1 = inlined_call_operand.hbm [shape: f32[128,256], index: 1, kind: input, shape index: {}]   ;;  %s775_s2 = inlined_call_operand.hbm [shape: f32[1,256], index: 2, kind: input, shape index: {}]   ;;  %s776_s3 = inlined_call_operand.hbm [shape: f32[256,128], index: 3, kind: input, shape index: {}]   ;;  %s777_s4 = inlined_call_operand.vmem [shape: f32[1,128], index: 4, kind: input, shape index: {}]   ;;  %s778_s5 = inlined_call_operand.hbm [shape: f32[16,128], index: 5, kind: output, shape index: {}]  }
   0x1   :  { %11 = vsyncpa [#allocation7], 0 }
   0x2   :  { %12 = vsyncpa [#allocation10], 0  ;;  %s31_s20 = sshll.u32 %s774_s1, 4  ;;  %s32_s20 = int_to_ptr.hbm [resolvable:$true] %s31_s20 }
   0x3   :  { %13 = vsyncpa [#allocation5], 0  ;;  %s609_s21 = smov [#allocation6]   ;;  %s18_s25 = sshll.u32 %s773_s0, 4  ;;  %s19_s25 = int_to_ptr.hbm [resolvable:$true] %s18_s25 }
   0x4   :  { %s33_s22 = sshll.u32 %s609_s21, 4  ;;  %s610_s26 = smov 256   ;;  %s34_s22 = int_to_ptr.vmem [resolvable:$true] %s33_s22 }
   0x5   :  { %s611_s27 = smov 16   ;;  %s612_s28 = smov [#allocation3]  }
   0x6   :  { %39 = dma.hbm_to_vmem [thread:$0]  %s32_s20, 4096, %s34_s22, [#allocation7], %s610_s26, %s610_s26, %s611_s27  }
   0x7   :  { %s20_s29 = sshll.u32 %s612_s28, 4  ;;  %s613_s30 = smov 128   ;;  %s21_s29 = int_to_ptr.vmem [resolvable:$true] %s20_s29 }
   0x8   :  { %s614_s6 = smov 8   ;;  %s45_s8 = sshll.u32 %s775_s2, 4  ;;  %s46_s8 = int_to_ptr.hbm [resolvable:$true] %s45_s8 }
   0x9   :  { %26 = dma.hbm_to_vmem [thread:$0]  %s19_s25, 256, %s21_s29, [#allocation4], %s613_s30, %s613_s30, %s614_s6  }
   0xa   :  { %s615_s9 = smov [#allocation8]   ;;  %s55_s12 = sshll.u32 %s776_s3, 4  ;;  %s56_s12 = int_to_ptr.hbm [resolvable:$true] %s55_s12 }
   0xb   :  { %s47_s0 = sshll.u32 %s615_s9, 4  ;;  %s616_s13 = smov [#allocation9]   ;;  %s48_s0 = int_to_ptr.vmem [resolvable:$true] %s47_s0 }
   0xc   :  { %50 = dma.hbm_to_vmem [thread:$0]  %s46_s8, 32, %s48_s0, [#allocation7]  }
   0xd   :  { %s57_s14 = sshll.u32 %s616_s13, 4  ;;  %s58_s14 = int_to_ptr.vmem [resolvable:$true] %s57_s14 }
   0xe   :  { %63 = dma.hbm_to_vmem [thread:$0]  %s56_s12, 4096, %s58_s14, [#allocation10], %s613_s30, %s613_s30, %s614_s6  }
   0xf   :  { %601 = dma.done.wait [#allocation4], 256  }
  0x10   :  { %602 = vsyncadd [#allocation4], 4294967040 }
  0x11   :  { %603 = dma.done.wait [#allocation7], 4128  }
  0x12   :  { %604 = vsyncadd [#allocation7], 4294963168 }
  0x13   :  { %605 = dma.done.wait [#allocation10], 4096  }
  0x14   :  { %606 = vsyncadd [#allocation10], 4294963200  ;;  %v120_v0 = vld [vmem:[#allocation6 + $0xf0] sm:$0xff]  ;;  %v121_v1 = vld [vmem:[#allocation6 + $0xf8] sm:$0xff]  ;;  %s617_s15 = smov [#allocation11]   ;;  %s444_s19 = sshll.u32 %s778_s5, 4  ;;  %s445_s19 = int_to_ptr.hbm [resolvable:$true] %s444_s19 }
  0x15   :  { %v118_v2 = vld [vmem:[#allocation6 + $0xe0] sm:$0xff]  ;;  %128 = vmatpush.msra.mxu0 %v120_v0  ;;  %151 = vmatpush.msra.mxu1 %v121_v1  ;;  %v119_v3 = vld [vmem:[#allocation6 + $0xe8] sm:$0xff]  ;;  %v116_v4 = vld [vmem:[#allocation6 + $0xd0] sm:$0xff]  ;;  %s442_s16 = sshll.u32 %s617_s15, 4  ;;  %s443_s16 = int_to_ptr.vmem [resolvable:$true] %s442_s16 }
  0x16   :  { %v117_v5 = vld [vmem:[#allocation6 + $0xd8] sm:$0xff]  ;;  %v114_v6 = vld [vmem:[#allocation6 + $0xc0] sm:$0xff]  ;;  %v115_v7 = vld [vmem:[#allocation6 + $0xc8] sm:$0xff] }
  0x17   :  { %129 = vmatpush.msra.mxu0 %v118_v2  ;;  %152 = vmatpush.msra.mxu1 %v119_v3  ;;  %v112_v8 = vld [vmem:[#allocation6 + $0xb0] sm:$0xff]  ;;  %v113_v9 = vld [vmem:[#allocation6 + $0xb8] sm:$0xff]  ;;  %v110_v10 = vld [vmem:[#allocation6 + $0xa0] sm:$0xff] }
  0x18   :  { %v111_v11 = vld [vmem:[#allocation6 + $0xa8] sm:$0xff]  ;;  %v108_v12 = vld [vmem:[#allocation6 + $0x90] sm:$0xff]  ;;  %v109_v13 = vld [vmem:[#allocation6 + $0x98] sm:$0xff] }
  0x19   :  { %130 = vmatpush.msra.mxu0 %v116_v4  ;;  %153 = vmatpush.msra.mxu1 %v117_v5  ;;  %v106_v14 = vld [vmem:[#allocation6 + $0x80] sm:$0xff]  ;;  %v107_v15 = vld [vmem:[#allocation6 + $0x88] sm:$0xff]  ;;  %v104_v16 = vld [vmem:[#allocation6 + $0x70] sm:$0xff] }
  0x1a   :  { %v105_v17 = vld [vmem:[#allocation6 + $0x78] sm:$0xff]  ;;  %v102_v18 = vld [vmem:[#allocation6 + $0x60] sm:$0xff]  ;;  %v103_v19 = vld [vmem:[#allocation6 + $0x68] sm:$0xff] }
  0x1b   :  { %131 = vmatpush.msra.mxu0 %v114_v6  ;;  %154 = vmatpush.msra.mxu1 %v115_v7  ;;  %v100_v20 = vld [vmem:[#allocation6 + $0x50] sm:$0xff]  ;;  %v101_v21 = vld [vmem:[#allocation6 + $0x58] sm:$0xff]  ;;  %v98_v22 = vld [vmem:[#allocation6 + $0x40] sm:$0xff] }
  0x1c   :  { %v99_v23 = vld [vmem:[#allocation6 + $0x48] sm:$0xff]  ;;  %v96_v24 = vld [vmem:[#allocation6 + $0x30] sm:$0xff]  ;;  %v97_v25 = vld [vmem:[#allocation6 + $0x38] sm:$0xff] }
  0x1d   :  { %132 = vmatpush.msra.mxu0 %v112_v8  ;;  %155 = vmatpush.msra.mxu1 %v113_v9  ;;  %v94_v26 = vld [vmem:[#allocation6 + $0x20] sm:$0xff]  ;;  %v95_v27 = vld [vmem:[#allocation6 + $0x28] sm:$0xff]  ;;  %v92_v28 = vld [vmem:[#allocation6 + $0x10] sm:$0xff] }
  0x1e   :  { %v93_v29 = vld [vmem:[#allocation6 + $0x18] sm:$0xff]  ;;  %v90_v30 = vld [vmem:[#allocation6] sm:$0xff]  ;;  %v91_v31 = vld [vmem:[#allocation6 + $0x8] sm:$0xff] }
  0x1f   :  { %133 = vmatpush.msra.mxu0 %v110_v10  ;;  %156 = vmatpush.msra.mxu1 %v111_v11  ;;  %v88_v32 = vld [vmem:[#allocation3] sm:$0xff]  ;;  %v89_v33 = vld [vmem:[#allocation3 + $0x8] sm:$0xff]  ;;  %v122_v38 = vld [vmem:[#allocation8] sm:$0x3] }
  0x20   :  { %v367_v34 = vld [vmem:[#allocation9 + $0x78] sm:$0xff]  ;;  %v366_v36 = vld [vmem:[#allocation9 + $0x70] sm:$0xff]  ;;  %v365_v39 = vld [vmem:[#allocation9 + $0x68] sm:$0xff]  ;;  %v124_v41 = vperm.slane %v122_v38, 0  ;;  %v125_v42 = vperm.slane %v122_v38, 1 }
  0x21   :  { %134 = vmatpush.msra.mxu0 %v108_v12  ;;  %157 = vmatpush.msra.mxu1 %v109_v13  ;;  %v383_v35 = vld [vmem:[#allocation9 + $0xf8] sm:$0xff]  ;;  %v382_v37 = vld [vmem:[#allocation9 + $0xf0] sm:$0xff]  ;;  %v381_v40 = vld [vmem:[#allocation9 + $0xe8] sm:$0xff] }
  0x22   :  { %384 = vmatpush.msra.mxu2 %v367_v34  ;;  %407 = vmatpush.msra.mxu3 %v383_v35  ;;  %v364_v43 = vld [vmem:[#allocation9 + $0x60] sm:$0xff]  ;;  %v363_v45 = vld [vmem:[#allocation9 + $0x58] sm:$0xff]  ;;  %v362_v51 = vld [vmem:[#allocation9 + $0x50] sm:$0xff] }
  0x23   :  { %135 = vmatpush.msra.mxu0 %v106_v14  ;;  %158 = vmatpush.msra.mxu1 %v107_v15  ;;  %v380_v44 = vld [vmem:[#allocation9 + $0xe0] sm:$0xff]  ;;  %v379_v46 = vld [vmem:[#allocation9 + $0xd8] sm:$0xff]  ;;  %v378_v52 = vld [vmem:[#allocation9 + $0xd0] sm:$0xff] }
  0x24   :  { %385 = vmatpush.msra.mxu2 %v366_v36  ;;  %408 = vmatpush.msra.mxu3 %v382_v37  ;;  %v361_v55 = vld [vmem:[#allocation9 + $0x48] sm:$0xff]  ;;  %v360_v59 = vld [vmem:[#allocation9 + $0x40] sm:$0xff]  ;;  %v359_v61 = vld [vmem:[#allocation9 + $0x38] sm:$0xff] }
  0x25   :  { %136 = vmatpush.msra.mxu0 %v104_v16  ;;  %159 = vmatpush.msra.mxu1 %v105_v17  ;;  %v377_v56 = vld [vmem:[#allocation9 + $0xc8] sm:$0xff]  ;;  %v376_v60 = vld [vmem:[#allocation9 + $0xc0] sm:$0xff]  ;;  %v375_v62 = vld [vmem:[#allocation9 + $0xb8] sm:$0xff] }
  0x26   :  { %386 = vmatpush.msra.mxu2 %v365_v39  ;;  %409 = vmatpush.msra.mxu3 %v381_v40  ;;  %v358_v3 = vld [vmem:[#allocation9 + $0x30] sm:$0xff]  ;;  %v357_v9 = vld [vmem:[#allocation9 + $0x28] sm:$0xff]  ;;  %v356_v16 = vld [vmem:[#allocation9 + $0x20] sm:$0xff] }
  0x27   :  { %137 = vmatpush.msra.mxu0 %v102_v18  ;;  %160 = vmatpush.msra.mxu1 %v103_v19  ;;  %v374_v4 = vld [vmem:[#allocation9 + $0xb0] sm:$0xff]  ;;  %v373_v10 = vld [vmem:[#allocation9 + $0xa8] sm:$0xff]  ;;  %v372_v17 = vld [vmem:[#allocation9 + $0xa0] sm:$0xff] }
  0x28   :  { %387 = vmatpush.msra.mxu2 %v364_v43  ;;  %410 = vmatpush.msra.mxu3 %v380_v44  ;;  %v353_v38 = vld [vmem:[#allocation9 + $0x8] sm:$0xff] }
  0x29   :  { %138 = vmatpush.msra.mxu0 %v100_v20  ;;  %161 = vmatpush.msra.mxu1 %v101_v21  ;;  %v369_v39 = vld [vmem:[#allocation9 + $0x88] sm:$0xff] }
  0x2a   :  { %388 = vmatpush.msra.mxu2 %v363_v45  ;;  %411 = vmatpush.msra.mxu3 %v379_v46  ;;  %v352_v46 = vld [vmem:[#allocation9] sm:$0xff] }
  0x2b   :  { %139 = vmatpush.msra.mxu0 %v98_v22  ;;  %162 = vmatpush.msra.mxu1 %v99_v23 }
  0x2c   :  { %389 = vmatpush.msra.mxu2 %v362_v51  ;;  %412 = vmatpush.msra.mxu3 %v378_v52 }
  0x2d   :  { %140 = vmatpush.msra.mxu0 %v96_v24  ;;  %163 = vmatpush.msra.mxu1 %v97_v25  ;;  %v355_v24 = vld [vmem:[#allocation9 + $0x18] sm:$0xff] }
  0x2e   :  { %390 = vmatpush.msra.mxu2 %v361_v55  ;;  %413 = vmatpush.msra.mxu3 %v377_v56  ;;  %v371_v25 = vld [vmem:[#allocation9 + $0x98] sm:$0xff] }
  0x2f   :  { %141 = vmatpush.msra.mxu0 %v94_v26  ;;  %164 = vmatpush.msra.mxu1 %v95_v27 }
  0x30   :  { %391 = vmatpush.msra.mxu2 %v360_v59  ;;  %414 = vmatpush.msra.mxu3 %v376_v60 }
  0x31   :  { %142 = vmatpush.msra.mxu0 %v92_v28  ;;  %165 = vmatpush.msra.mxu1 %v93_v29 }
  0x32   :  { %392 = vmatpush.msra.mxu2 %v359_v61  ;;  %415 = vmatpush.msra.mxu3 %v375_v62 }
  0x33   :  { %143 = vmatpush.msra.mxu0 %v90_v30  ;;  %166 = vmatpush.msra.mxu1 %v91_v31 }
  0x34   :  { %144 = vmatmul.f32.vlgmr.msra.gmra.mxu0 %v88_v32  ;;  %167 = vmatmul.f32.vlgmr.msra.gmra.mxu1 %v88_v32  ;;  %v354_v32 = vld [vmem:[#allocation9 + $0x10] sm:$0xff] }
  0x35   :  { %393 = vmatpush.msra.mxu2 %v358_v3  ;;  %416 = vmatpush.msra.mxu3 %v374_v4 }
  0x37   :  { %394 = vmatpush.msra.mxu2 %v357_v9  ;;  %417 = vmatpush.msra.mxu3 %v373_v10 }
  0x39   :  { %395 = vmatpush.msra.mxu2 %v356_v16  ;;  %418 = vmatpush.msra.mxu3 %v372_v17 }
  0x3b   :  { %396 = vmatpush.msra.mxu2 %v355_v24  ;;  %419 = vmatpush.msra.mxu3 %v371_v25 }
  0x3c   :  { %147 = vmatmul.f32.gmra.mxu0 %v89_v33  ;;  %170 = vmatmul.f32.gmra.mxu1 %v89_v33  ;;  %v370_v33 = vld [vmem:[#allocation9 + $0x90] sm:$0xff] }
  0x3d   :  { %397 = vmatpush.msra.mxu2 %v354_v32  ;;  %420 = vmatpush.msra.mxu3 %v370_v33 }
  0x3f   :  { %398 = vmatpush.msra.mxu2 %v353_v38  ;;  %421 = vmatpush.msra.mxu3 %v369_v39 }
  0x41   :  { %399 = vmatpush.msra.mxu2 %v352_v46 }
  0xb1   :  { %v145_v47 = vpop.f32.mrf.mxu0  ;;  %v168_v48 = vpop.f32.mrf.mxu1 }
  0xb2   :  { %v666_v49 = vadd.f32 %v145_v47, %v124_v41  ;;  %v668_v50 = vadd.f32 %v168_v48, %v125_v42  ;;  %v368_v47 = vld [vmem:[#allocation9 + $0x80] sm:$0xff] }
  0xb3   :  { %422 = vmatpush.msra.mxu3 %v368_v47 }
  0xb4   :  { %v671_v53 = vmul.f32 0.70710677, %v666_v49  ;;  %v674_v54 = vmul.f32 0.70710677, %v668_v50 }
  0xb6   :  { %v182_v57 = vmul.f32 %v671_v53, %v671_v53  ;;  %v222_v58 = vmul.f32 %v674_v54, %v674_v54 }
  0xb8   :  { %v680_v63 = vmin.f32 %v182_v57, 16.0  ;;  %v682_v0 = vmin.f32 %v222_v58, 16.0 }
  0xb9   :  { %v148_v1 = vpop.f32.mrf.mxu0  ;;  %v171_v2 = vpop.f32.mrf.mxu1 }
  0xba   :  { %v184_v5 = vmul.f32 2.1237322e-06, %v680_v63  ;;  %v224_v6 = vmul.f32 2.1237322e-06, %v682_v0  ;;  %v686_v7 = vadd.f32 %v148_v1, %v124_v41  ;;  %v688_v8 = vadd.f32 %v171_v2, %v125_v42 }
  0xbb   :  { %v195_v11 = vmul.f32 3.8918573e-05, %v680_v63  ;;  %v235_v21 = vmul.f32 3.8918573e-05, %v682_v0 }
  0xbc   :  { %v185_v12 = vadd.f32 0.00028619796, %v184_v5  ;;  %v225_v13 = vadd.f32 0.00028619796, %v224_v6  ;;  %v692_v14 = vmul.f32 0.70710677, %v686_v7 }
  0xbd   :  { %v695_v15 = vmul.f32 0.70710677, %v688_v8  ;;  %v196_v20 = vadd.f32 0.001143296, %v195_v11  ;;  %v236_v29 = vadd.f32 0.001143296, %v235_v21 }
  0xbe   :  { %v186_v18 = vmul.f32 %v185_v12, %v680_v63  ;;  %v226_v19 = vmul.f32 %v225_v13, %v682_v0  ;;  %v262_v22 = vmul.f32 %v692_v14, %v692_v14 }
  0xbf   :  { %v302_v23 = vmul.f32 %v695_v15, %v695_v15  ;;  %v197_v28 = vmul.f32 %v196_v20, %v680_v63  ;;  %v237_v36 = vmul.f32 %v236_v29, %v682_v0 }
  0xc0   :  { %v187_v26 = vadd.f32 0.0036580483, %v186_v18  ;;  %v227_v27 = vadd.f32 0.0036580483, %v226_v19  ;;  %v705_v30 = vmin.f32 %v262_v22, 16.0 }
  0xc1   :  { %v707_v31 = vmin.f32 %v302_v23, 16.0  ;;  %v198_v35 = vadd.f32 0.014752088, %v197_v28  ;;  %v238_v44 = vadd.f32 0.014752088, %v237_v36 }
  0xc2   :  { %v188_v34 = vmul.f32 %v187_v26, %v680_v63  ;;  %v264_v37 = vmul.f32 2.1237322e-06, %v705_v30  ;;  %v275_v40 = vmul.f32 3.8918573e-05, %v705_v30  ;;  %v228_v41 = vmul.f32 %v227_v27, %v682_v0 }
  0xc3   :  { %v304_v42 = vmul.f32 2.1237322e-06, %v707_v31  ;;  %v199_v43 = vmul.f32 %v198_v35, %v680_v63  ;;  %v239_v55 = vmul.f32 %v238_v44, %v682_v0  ;;  %v315_v58 = vmul.f32 3.8918573e-05, %v707_v31 }
  0xc4   :  { %v265_v45 = vadd.f32 0.00028619796, %v264_v37  ;;  %v276_v48 = vadd.f32 0.001143296, %v275_v40  ;;  %v189_v51 = vadd.f32 0.05243302, %v188_v34 }
  0xc5   :  { %v200_v52 = vadd.f32 0.112945676, %v199_v43  ;;  %v229_v59 = vadd.f32 0.05243302, %v228_v41  ;;  %v305_v60 = vadd.f32 0.00028619796, %v304_v42 }
  0xc6   :  { %v266_v56 = vmul.f32 %v265_v45, %v705_v30  ;;  %v277_v57 = vmul.f32 %v276_v48, %v705_v30  ;;  %v240_v62 = vadd.f32 0.112945676, %v239_v55  ;;  %v190_v3 = vmul.f32 %v189_v51, %v680_v63 }
  0xc7   :  { %v201_v61 = vmul.f32 %v200_v52, %v680_v63  ;;  %v316_v9 = vadd.f32 0.001143296, %v315_v58  ;;  %v230_v10 = vmul.f32 %v229_v59, %v682_v0  ;;  %v306_v11 = vmul.f32 %v305_v60, %v707_v31 }
  0xc8   :  { %v267_v1 = vadd.f32 0.0036580483, %v266_v56  ;;  %v278_v2 = vadd.f32 0.014752088, %v277_v57  ;;  %v241_v5 = vmul.f32 %v240_v62, %v682_v0  ;;  %v191_v19 = vadd.f32 0.18741608, %v190_v3 }
  0xc9   :  { %v202_v4 = vadd.f32 0.4994258, %v201_v61  ;;  %v317_v18 = vmul.f32 %v316_v9, %v707_v31  ;;  %v231_v24 = vadd.f32 0.18741608, %v230_v10  ;;  %v307_v25 = vadd.f32 0.0036580483, %v306_v11 }
  0xca   :  { %v279_v6 = vmul.f32 %v278_v2, %v705_v30  ;;  %v242_v13 = vadd.f32 0.4994258, %v241_v5  ;;  %v268_v16 = vmul.f32 %v267_v1, %v705_v30  ;;  %v192_v29 = vmul.f32 %v191_v19, %v680_v63 }
  0xcb   :  { %v203_v12 = vmul.f32 %v202_v4, %v680_v63  ;;  %v318_v23 = vadd.f32 0.014752088, %v317_v18  ;;  %v232_v33 = vmul.f32 %v231_v24, %v682_v0  ;;  %v308_v34 = vmul.f32 %v307_v25, %v707_v31 }
  0xcc   :  { %v280_v17 = vadd.f32 0.112945676, %v279_v6  ;;  %v243_v21 = vmul.f32 %v242_v13, %v682_v0  ;;  %v269_v26 = vadd.f32 0.05243302, %v268_v16  ;;  %v193_v39 = vadd.f32 1.1283791, %v192_v29 }
  0xcd   :  { %v204_v20 = vadd.f32 1.0, %v203_v12  ;;  %v319_v28 = vmul.f32 %v318_v23, %v707_v31  ;;  %v233_v43 = vadd.f32 1.1283791, %v232_v33  ;;  %v309_v63 = vadd.f32 0.05243302, %v308_v34 }
  0xce   :  { %v281_v22 = vmul.f32 %v280_v17, %v705_v30  ;;  %v244_v27 = vadd.f32 1.0, %v243_v21  ;;  %v270_v37 = vmul.f32 %v269_v26, %v705_v30  ;;  %v194_v47 = vmul.f32 %v193_v39, %v671_v53 }
  0xcf   :  { %473 = vrcp.f32 %v204_v20  ;;  %v320_v36 = vadd.f32 0.112945676, %v319_v28  ;;  %v216_v48 = vand.u32 2147483648, %v204_v20  ;;  %v214_v55 = vand.u32 2147483647, %v204_v20 }
  0xd0   :  { %v282_v32 = vadd.f32 0.4994258, %v281_v22  ;;  %475 = vrcp.f32 %v244_v27  ;;  %v271_v0 = vadd.f32 0.18741608, %v270_v37  ;;  %v234_v57 = vmul.f32 %v233_v43, %v674_v54 }
  0xd1   :  { %v321_v41 = vmul.f32 %v320_v36, %v707_v31  ;;  %v310_v58 = vmul.f32 %v309_v63, %v707_v31  ;;  %vm210_vm1 = vweird.f32 %v204_v20  ;;  %v256_v62 = vand.u32 2147483648, %v244_v27 }
  0xd2   :  { %v283_v35 = vmul.f32 %v282_v32, %v705_v30  ;;  %v272_v60 = vmul.f32 %v271_v0, %v705_v30  ;;  %v217_v2 = vor.u32 1.1754944e-38, %v216_v48  ;;  %v254_v4 = vand.u32 2147483647, %v244_v27 }
  0xd3   :  { %v322_v46 = vadd.f32 0.4994258, %v321_v41  ;;  %vm215_vm4 = vcmp.eq.f32.partialorder %v214_v55, 8.507059e+37  ;;  %v311_v6 = vadd.f32 0.18741608, %v310_v58  ;;  %vm250_vm5 = vweird.f32 %v244_v27 }
  0xd4   :  { %v737_v40 = vadd.f32 1.0, %v283_v35  ;;  %v273_v30 = vadd.f32 1.1283791, %v272_v60  ;;  %v257_v12 = vor.u32 1.1754944e-38, %v256_v62  ;;  %vm255_vm7 = vcmp.eq.f32.partialorder %v254_v4, 8.507059e+37 }
  0xd5   :  { %v474_v38 = vpop.eup %473  ;;  %v323_v56 = vmul.f32 %v322_v46, %v707_v31  ;;  %v174_v22 = vmul.f32 0.5, %v666_v49  ;;  %v312_v25 = vmul.f32 %v311_v6, %v707_v31  ;;  %v175_v49 = vmul.f32 0.5, %v668_v50 }
  0xd6   :  { %v206_v42 = vmul.f32 %v474_v38, %v204_v20  ;;  %477 = vrcp.f32 %v737_v40  ;;  %v476_v44 = vpop.eup %475  ;;  %vm211_vm0 = vweird.f32 %v474_v38  ;;  %v294_v17 = vand.u32 2147483647, %v737_v40 }
  0xd7   :  { %v246_v51 = vmul.f32 %v476_v44, %v244_v27  ;;  %v746_v1 = vadd.f32 1.0, %v323_v56  ;;  %vm212_vm2 = vmor %vm210_vm1, %vm211_vm0  ;;  %vm251_vm3 = vweird.f32 %v476_v44  ;;  %v296_v18 = vand.u32 2147483648, %v737_v40 }
  0xd8   :  { %v207_v45 = vsub.f32 1.0, %v206_v42  ;;  %vm252_vm6 = vmor %vm250_vm5, %vm251_vm3  ;;  %vm290_vm9 = vweird.f32 %v737_v40  ;;  %v274_v33 = vmul.f32 %v273_v30, %v692_v14  ;;  %vm295_vm11 = vcmp.eq.f32.partialorder %v294_v17, 8.507059e+37 }
  0xd9   :  { %v247_v59 = vsub.f32 1.0, %v246_v51  ;;  %479 = vrcp.f32 %v746_v1  ;;  %v297_v29 = vor.u32 1.1754944e-38, %v296_v18  ;;  %v313_v31 = vadd.f32 1.1283791, %v312_v25 }
  0xda   :  { %v208_v52 = vmul.f32 %v474_v38, %v207_v45  ;;  %v334_v43 = vand.u32 2147483647, %v746_v1  ;;  %vm330_vm13 = vweird.f32 %v746_v1  ;;  %v176_v50 = vmul.f32 0.5, %v686_v7  ;;  %v472_v7 = vld [vmem:[%s777_s4] ss:$0 sm:$0xff] }
  0xdb   :  { %v248_v3 = vmul.f32 %v476_v44, %v247_v59  ;;  %v314_v45 = vmul.f32 %v313_v31, %v695_v15  ;;  %v177_v55 = vmul.f32 0.5, %v688_v8 }
  0xdc   :  { %v209_v61 = vadd.f32 %v474_v38, %v208_v52  ;;  %v478_v53 = vpop.eup %477  ;;  %vm335_vm15 = vcmp.eq.f32.partialorder %v334_v43, 8.507059e+37 }
  0xdd   :  { %v286_v54 = vmul.f32 %v478_v53, %v737_v40  ;;  %v249_v10 = vadd.f32 %v476_v44, %v248_v3  ;;  %vm291_vm8 = vweird.f32 %v478_v53  ;;  %v336_v40 = vand.u32 2147483648, %v746_v1 }
  0xde   :  { %v213_v5 = vsel %vm212_vm2, %v474_v38, %v209_v61  ;;  %vm292_vm10 = vmor %vm290_vm9, %vm291_vm8 }
  0xdf   :  { %v218_v9 = vsel %vm215_vm4, %v217_v2, %v213_v5  ;;  %v287_v13 = vsub.f32 1.0, %v286_v54  ;;  %v253_v16 = vsel %vm252_vm6, %v476_v44, %v249_v10  ;;  %v480_v24 = vpop.eup %479  ;;  %v337_v0 = vor.u32 1.1754944e-38, %v336_v40 }
  0xe0   :  { %v219_v11 = vmul.f32 %v218_v9, %v194_v47  ;;  %v258_v20 = vsel %vm255_vm7, %v257_v12, %v253_v16  ;;  %v326_v32 = vmul.f32 %v480_v24, %v746_v1  ;;  %vm331_vm12 = vweird.f32 %v480_v24 }
  0xe1   :  { %v288_v21 = vmul.f32 %v478_v53, %v287_v13  ;;  %v259_v23 = vmul.f32 %v258_v20, %v234_v57  ;;  %vm332_vm14 = vmor %vm330_vm13, %vm331_vm12 }
  0xe2   :  { %v459_v19 = vclamps-f32 %v219_v11, 1.0  ;;  %v327_v38 = vsub.f32 1.0, %v326_v32 }
  0xe3   :  { %v289_v27 = vadd.f32 %v478_v53, %v288_v21  ;;  %v460_v28 = vclamps-f32 %v259_v23, 1.0 }
  0xe4   :  { %v342_v26 = vadd.f32 1.0, %v459_v19  ;;  %v328_v42 = vmul.f32 %v480_v24, %v327_v38 }
  0xe5   :  { %v293_v35 = vsel %vm292_vm10, %v478_v53, %v289_v27  ;;  %v343_v36 = vadd.f32 1.0, %v460_v28 }
  0xe6   :  { %v346_v34 = vmul.f32 %v342_v26, %v174_v22  ;;  %v298_v37 = vsel %vm295_vm11, %v297_v29, %v293_v35  ;;  %v329_v14 = vadd.f32 %v480_v24, %v328_v42 }
  0xe7   :  { %v299_v39 = vmul.f32 %v298_v37, %v274_v33  ;;  %v347_v41 = vmul.f32 %v343_v36, %v175_v49 }
  0xe8   :  { %400 = vmatmul.f32.vlgmr.msra.gmra.mxu2 %v346_v34  ;;  %v333_v46 = vsel %vm332_vm14, %v480_v24, %v329_v14 }
  0xe9   :  { %v461_v63 = vclamps-f32 %v299_v39, 1.0  ;;  %423 = vmatmul.f32.vlgmr.msra.gmra.mxu3 %v347_v41  ;;  %v338_v48 = vsel %vm335_vm15, %v337_v0, %v333_v46 }
  0xea   :  { %v339_v51 = vmul.f32 %v338_v48, %v314_v45 }
  0xeb   :  { %v344_v44 = vadd.f32 1.0, %v461_v63 }
  0xec   :  { %v462_v52 = vclamps-f32 %v339_v51, 1.0 }
  0xed   :  { %v348_v47 = vmul.f32 %v344_v44, %v176_v50 }
  0xee   :  { %v345_v56 = vadd.f32 1.0, %v462_v52 }
  0xf0   :  { %403 = vmatmul.f32.gmra.mxu2 %v348_v47  ;;  %v349_v57 = vmul.f32 %v345_v56, %v177_v55 }
  0xf2   :  { %426 = vmatmul.f32.gmra.mxu3 %v349_v57 }
 0x16b   :  { %v401_v58 = vpop.f32.mrf.mxu2 }
 0x16c   :  { %v424_v59 = vpop.f32.mrf.mxu3 }
 0x16d   :  { %v425_v60 = vadd.f32 %v424_v59, %v401_v58 }
 0x16f   :  { %v430_v15 = vadd.f32 %v472_v7, %v425_v60 }
 0x171   :  { %436 = vst [vmem:[#allocation11] sm:$0xff] %v430_v15 }
 0x173   :  { %v404_v61 = vpop.f32.mrf.mxu2 }
 0x175   :  { %v427_v62 = vpop.f32.mrf.mxu3 }
 0x176   :  { %v428_v8 = vadd.f32 %v427_v62, %v404_v61 }
 0x178   :  { %v431_v1 = vadd.f32 %v472_v7, %v428_v8 }
 0x17a   :  { %437 = vst [vmem:[#allocation11 + $0x8] sm:$0xff] %v431_v1 }
 0x17b   :  { %450 = dma.vmem_to_hbm [thread:$0]  %s443_s16, 256, %s445_s19, [#allocation5], %s613_s30, %s613_s30, %s614_s6  }
 0x17c   :  { %607 = dma.done.wait [#allocation5], 256  }
 0x17d   :  { %608 = vsyncadd [#allocation5], 4294967040 }
 0x17e   :  { %455 = vsyncpa [#allocation4], 1 }
 0x17f   :  { %456 = vsyncpa [#allocation7], 1 }
 0x180   :  { %457 = vsyncpa [#allocation10], 1 }
 0x181   :  { %458 = vsyncpa [#allocation5], 1 }

</bundles_post_ra>
